<compile_context>
chip_gen: v7x
topology: tpu7x:2x2x1
jax: 0.10.0
libtpu: 0.0.40
codegen_flags: <defaults>
</compile_context>

<pallas_src>
import math

import jax
import jax.numpy as jnp
from jax.experimental import pallas as pl
from jax.experimental.pallas import tpu as pltpu


NEG_INF = -1e30  # large finite additive causal mask (safe with max-subtract softmax)

_VMEM_LIMIT = None


def _vmem_limit():
    """~3/4 of physical VMEM, capped at 100 MiB (≈48 MiB v7x, ≈96 MiB v5e/v6e)."""
    global _VMEM_LIMIT
    if _VMEM_LIMIT is None:
        try:
            cap = int(pltpu.get_tpu_info().vmem_capacity_bytes)
        except Exception:
            cap = 64 * 1024 * 1024
        _VMEM_LIMIT = min(cap - cap // 4, 100 * 1024 * 1024)
    return _VMEM_LIMIT


def _fit_tile(n, target):
    """Largest divisor of n that is <= target."""
    t = max(1, min(target, n))
    while n % t:
        t -= 1
    return t


def _rep_spec(shape):
    """Full-array block, constant block index, single-buffered (weights)."""
    nd = len(shape)
    return pl.BlockSpec(shape, lambda *_, _nd=nd: (0,) * _nd,
                        pipeline_mode=pl.Buffered(1))


# ----------------------------- in-kernel helpers -----------------------------

def _layernorm(x, w, b, eps=1e-5):
    # x: (rows, C) f32; w, b: (1, C)
    mu = jnp.mean(x, axis=-1, keepdims=True)
    var = jnp.mean((x - mu) ** 2, axis=-1, keepdims=True)
    return (x - mu) * jax.lax.rsqrt(var + eps) * w.astype(jnp.float32) \
        + b.astype(jnp.float32)


def _gelu_tanh(x):
    # matches torch.nn.GELU(approximate='tanh')
    c = math.sqrt(2.0 / math.pi)
    return 0.5 * x * (1.0 + jnp.tanh(c * (x + 0.044715 * x * x * x)))


# ------------------------------- Pallas kernels -------------------------------

def qkv_kernel(x_ref, ln1_w_ref, ln1_b_ref, attn_w_ref, attn_b_ref,
               q_ref, k_ref, v_ref):
    """LN1 + QKV projection for one (batch, seq-tile); emits head-major Q/K/V."""
    _, TQ, C = x_ref.shape
    _, H, _, hd = q_ref.shape

    xf = x_ref[0].astype(jnp.float32)                                   # (TQ, C)
    h = _layernorm(xf, ln1_w_ref[...], ln1_b_ref[...]).astype(jnp.bfloat16)
    qkv = jnp.dot(h, attn_w_ref[...],
                  preferred_element_type=jnp.float32) + attn_b_ref[...]  # (TQ, 3C)

    # TODO(synk): replace the per-head lane slices with a single
    # pltpu.einshape('t(hd)->htd') pass (or head-pair (H//2, T, 2*hd) slabs for
    # full lane density) once verified on the target toolchain.
    q_ref[0] = jnp.stack([qkv[:, h_ * hd:(h_ + 1) * hd]
                          for h_ in range(H)], axis=0).astype(q_ref.dtype)
    k_ref[0] = jnp.stack([qkv[:, C + h_ * hd:C + (h_ + 1) * hd]
                          for h_ in range(H)], axis=0).astype(k_ref.dtype)
    v_ref[0] = jnp.stack([qkv[:, 2 * C + h_ * hd:2 * C + (h_ + 1) * hd]
                          for h_ in range(H)], axis=0).astype(v_ref.dtype)


def attn_mlp_kernel(x_ref, q_ref, k_ref, v_ref,
                    attn_pw_ref, attn_pb_ref,
                    ln2_w_ref, ln2_b_ref,
                    fc_w_ref, fc_b_ref,
                    mlp_pw_ref, mlp_pb_ref,
                    o_ref):
    """Causal attention (all heads batched) + output proj + MLP for one
    (batch, query-tile).  K/V arrive pre-projected and head-major, so there is
    no init phase, no scratch and no pl.when — both grid axes are parallel."""
    _, H, TQ, hd = q_ref.shape
    T = k_ref.shape[2]
    C = H * hd
    start = pl.program_id(1) * TQ          # global row offset of this query tile

    qh = q_ref[0]                          # (H, TQ, hd) bf16
    kh = k_ref[0]                          # (H, T,  hd) bf16
    vh = v_ref[0]                          # (H, T,  hd) bf16

    # scores for all heads in one batched einsum; finite additive causal mask
    s = jnp.einsum('hqd,hkd->hqk', qh, kh,
                   preferred_element_type=jnp.float32) * (1.0 / math.sqrt(hd))
    row = jax.lax.broadcasted_iota(jnp.int32, (TQ, T), 0) + start
    col = jax.lax.broadcasted_iota(jnp.int32, (TQ, T), 1)
    s = s + jnp.where(col <= row, 0.0, NEG_INF)[None, :, :]             # (H, TQ, T)

    m = jnp.max(s, axis=-1, keepdims=True)
    p = jnp.exp(s - m)
    p = p * pl.reciprocal(jnp.sum(p, axis=-1, keepdims=True), approx=True)
    y = jnp.einsum('hqk,hkd->hqd', p.astype(jnp.bfloat16), vh,
                   preferred_element_type=jnp.float32)                  # (H, TQ, hd)

    # merge heads once (lane concat) -> single (TQ,C)@(C,C) output projection
    yc = jnp.concatenate([y[h] for h in range(H)], axis=-1).astype(jnp.bfloat16)
    attn_out = jnp.dot(yc, attn_pw_ref[...],
                       preferred_element_type=jnp.float32) + attn_pb_ref[...]

    x1 = x_ref[0].astype(jnp.float32) + attn_out                        # (TQ, C) f32

    # MLP.  TODO(synk): at GPT-2 scale on v7x, K-tile the 4C hidden dim
    # (reduction grid axis + f32 accumulator) and flash-tile attention over key
    # blocks if q_tile is raised to 256.
    h2 = _layernorm(x1, ln2_w_ref[...], ln2_b_ref[...]).astype(jnp.bfloat16)
    h2 = jnp.dot(h2, fc_w_ref[...],
                 preferred_element_type=jnp.float32) + fc_b_ref[...]
    h2 = _gelu_tanh(h2).astype(jnp.bfloat16)
    h2 = jnp.dot(h2, mlp_pw_ref[...],
                 preferred_element_type=jnp.float32) + mlp_pb_ref[...]

    o_ref[0] = (x1 + h2).astype(o_ref.dtype)


def lnf_kernel(x_ref, w_ref, b_ref, o_ref):
    """Final LayerNorm, computed exactly once (hoisted out of the lm_head)."""
    o_ref[...] = _layernorm(x_ref[...].astype(jnp.float32),
                            w_ref[...], b_ref[...]).astype(o_ref.dtype)


def lm_head_kernel(h_ref, wt_ref, o_ref):
    """Tied lm_head matmul on one (row-tile, vocab-tile) block."""
    o_ref[...] = jnp.dot(h_ref[...], wt_ref[...],
                         preferred_element_type=jnp.float32).astype(o_ref.dtype)


# ------------------------------- wrappers -------------------------------------

def qkv_forward(x, lp, n_head, q_tile):
    B, T, C = x.shape
    H, hd = n_head, C // n_head
    nq = T // q_tile
    weights = [lp['ln1_w'], lp['ln1_b'], lp['attn_w'], lp['attn_b']]
    qkv_spec = pl.BlockSpec((1, H, q_tile, hd), lambda b, q: (b, 0, q, 0))
    return pl.pallas_call(
        qkv_kernel,
        out_shape=[jax.ShapeDtypeStruct((B, H, T, hd), jnp.bfloat16)] * 3,
        grid=(B, nq),
        in_specs=[pl.BlockSpec((1, q_tile, C), lambda b, q: (b, q, 0))]
        + [_rep_spec(w.shape) for w in weights],
        out_specs=[qkv_spec] * 3,
        compiler_params=pltpu.CompilerParams(
            dimension_semantics=("parallel", "parallel"),
            vmem_limit_bytes=_vmem_limit()),
    )(x, *weights)


def attn_mlp_forward(x, q, k, v, lp, q_tile):
    B, T, C = x.shape
    _, H, _, hd = q.shape
    nq = T // q_tile
    weights = [lp['attn_pw'], lp['attn_pb'], lp['ln2_w'], lp['ln2_b'],
               lp['fc_w'], lp['fc_b'], lp['mlp_pw'], lp['mlp_pb']]
    in_specs = [
        pl.BlockSpec((1, q_tile, C), lambda b, qb: (b, qb, 0)),         # residual x
        pl.BlockSpec((1, H, q_tile, hd), lambda b, qb: (b, 0, qb, 0)),  # Q tile
        pl.BlockSpec((1, H, T, hd), lambda b, qb: (b, 0, 0, 0)),        # K full seq
        pl.BlockSpec((1, H, T, hd), lambda b, qb: (b, 0, 0, 0)),        # V full seq
    ] + [_rep_spec(w.shape) for w in weights]
    return pl.pallas_call(
        attn_mlp_kernel,
        out_shape=jax.ShapeDtypeStruct((B, T, C), jnp.bfloat16),
        grid=(B, nq),
        in_specs=in_specs,
        out_specs=pl.BlockSpec((1, q_tile, C), lambda b, qb: (b, qb, 0)),
        compiler_params=pltpu.CompilerParams(
            dimension_semantics=("parallel", "parallel"),
            vmem_limit_bytes=_vmem_limit()),
    )(x, q, k, v, *weights)


def lnf_forward(x2d, w, b, m_tile):
    M, C = x2d.shape
    return pl.pallas_call(
        lnf_kernel,
        out_shape=jax.ShapeDtypeStruct((M, C), jnp.bfloat16),
        grid=(M // m_tile,),
        in_specs=[pl.BlockSpec((m_tile, C), lambda m: (m, 0)),
                  _rep_spec(w.shape), _rep_spec(b.shape)],
        out_specs=pl.BlockSpec((m_tile, C), lambda m: (m, 0)),
        compiler_params=pltpu.CompilerParams(
            dimension_semantics=("parallel",),
            vmem_limit_bytes=_vmem_limit()),
    )(x2d, w, b)


def lm_head_forward(h2d, wte_t, m_tile, v_tile, logits_dtype=jnp.bfloat16):
    M, C = h2d.shape
    V = wte_t.shape[1]
    # Vocab axis OUTERMOST, row tiles innermost: the (C, V) tied weight's block
    # index is constant across the inner loop, so it streams from HBM exactly
    # once; only the small (B*T, C) activation re-streams per vocab tile.
    return pl.pallas_call(
        lm_head_kernel,
        out_shape=jax.ShapeDtypeStruct((M, V), logits_dtype),
        grid=(V // v_tile, M // m_tile),
        in_specs=[pl.BlockSpec((m_tile, C), lambda v, m: (m, 0)),
                  pl.BlockSpec((C, v_tile), lambda v, m: (0, v))],
        out_specs=pl.BlockSpec((m_tile, v_tile), lambda v, m: (m, v)),
        compiler_params=pltpu.CompilerParams(
            dimension_semantics=("parallel", "parallel"),
            vmem_limit_bytes=_vmem_limit()),
    )(h2d, wte_t)


def gpt_forward(idx, params, n_head, q_tile=128, m_tile=256, v_tile=512,
                logits_dtype=jnp.bfloat16):
    """idx: (B, T) int32 token ids -> logits (B, T, vocab) in `logits_dtype`.

    q_tile=128 works on all generations (keeps the (H,TQ,T) f32 score tensor
    inside v7x's 64 MiB VMEM; 256 is fine on v5e/v6e).  v_tile=512 suits the
    256-wide MXU on v6e/v7x (use 256 on v5e).  Tiles are clamped to divisors of
    the actual dims, so the small test shapes below just work.
    """
    B, T = idx.shape
    V, C = params['wte'].shape
    q_tile = _fit_tile(T, q_tile)
    m_tile = _fit_tile(B * T, m_tile)
    v_tile = _fit_tile(V, v_tile)

    # TODO(synk): token/position embedding gathers stay plain-JAX (no clean
    # rectangular BlockSpec for a token gather); cross-entropy loss path
    # (targets != None) is omitted.
    tok_emb = jnp.take(params['wte'], idx, axis=0)            # (B, T, C) bf16
    pos_emb = params['wpe'][:T]                               # (T, C)    bf16
    x = (tok_emb + pos_emb[None, :, :]).astype(jnp.bfloat16)

    for lp in params['layers']:
        q, k, v = qkv_forward(x, lp, n_head, q_tile)
        x = attn_mlp_forward(x, q, k, v, lp, q_tile)

    h2d = lnf_forward(x.reshape(B * T, C), params['lnf_w'], params['lnf_b'], m_tile)
    logits = lm_head_forward(h2d, params['wte_t'], m_tile, v_tile, logits_dtype)
    return logits.reshape(B, T, V)


# ------------------------------ parameter init --------------------------------

def init_params(key, vocab_size, block_size, n_layer, n_head, n_embd):
    C = n_embd
    keys = iter(jax.random.split(key, 4 + 8 * n_layer))

    def nrm(shape, std):
        return (jax.random.normal(next(keys), shape, jnp.float32) * std
                ).astype(jnp.bfloat16)

    scale_std = 0.02 * (2 * n_layer) ** -0.5                  # NANOGPT_SCALE_INIT
    wte = nrm((vocab_size, C), 0.02)                          # tied with lm_head
    wpe = nrm((block_size, C), 0.02)

    layers = []
    for _ in range(n_layer):
        layers.append(dict(
            ln1_w=jnp.ones((1, C), jnp.float32), ln1_b=jnp.zeros((1, C), jnp.float32),
            attn_w=nrm((C, 3 * C), 0.02), attn_b=jnp.zeros((1, 3 * C), jnp.float32),
            attn_pw=nrm((C, C), scale_std), attn_pb=jnp.zeros((1, C), jnp.float32),
            ln2_w=jnp.ones((1, C), jnp.float32), ln2_b=jnp.zeros((1, C), jnp.float32),
            fc_w=nrm((C, 4 * C), 0.02), fc_b=jnp.zeros((1, 4 * C), jnp.float32),
            mlp_pw=nrm((4 * C, C), scale_std), mlp_pb=jnp.zeros((1, C), jnp.float32),
        ))

    # NOTE: wte / wte_t are stored separately (correct for inference; they would
    # silently de-tie under training).
    return dict(wte=wte, wpe=wpe,
                wte_t=jnp.transpose(wte),     # tied lm_head weight, transposed ONCE
                layers=layers,
                lnf_w=jnp.ones((1, C), jnp.float32),
                lnf_b=jnp.zeros((1, C), jnp.float32))


# ----------------------------------- main --------------------------------------

if __name__ == "__main__":
    # small GPT config (vocab multiple of 128 so the lm_head vocab tile is lane-dense)
    vocab_size, block_size, n_layer, n_head, n_embd = 128, 16, 2, 2, 32
    B, T = 2, 16

    key = jax.random.PRNGKey(0)
    k_param, k_idx = jax.random.split(key)
    params = init_params(k_param, vocab_size, block_size, n_layer, n_head, n_embd)
    idx = jax.random.randint(k_idx, (B, T), 0, vocab_size, dtype=jnp.int32)

    logits = gpt_forward(idx, params, n_head)
    logits = jax.block_until_ready(logits)
    assert logits.shape == (B, T, vocab_size)
    assert bool(jnp.isfinite(logits.astype(jnp.float32)).all())
    print("KERNEL_OK")
</pallas_src>

<mosaic_0001>
module attributes {stable_mosaic.version = 11 : i64} {
  func.func @qkv_kernel(%arg0: i32, %arg1: i32, %arg2: memref<1x16x32xbf16, #tpu.memory_space<vmem>>, %arg3: memref<1x32xf32, #tpu.memory_space<vmem>>, %arg4: memref<1x32xf32, #tpu.memory_space<vmem>>, %arg5: memref<32x96xbf16, #tpu.memory_space<vmem>>, %arg6: memref<1x96xf32, #tpu.memory_space<vmem>>, %arg7: memref<1x2x16x16xbf16, #tpu.memory_space<vmem>>, %arg8: memref<1x2x16x16xbf16, #tpu.memory_space<vmem>>, %arg9: memref<1x2x16x16xbf16, #tpu.memory_space<vmem>>) attributes {dimension_semantics = [#tpu.dimension_semantics<parallel>, #tpu.dimension_semantics<parallel>], iteration_bounds = array<i64: 2, 1>, scalar_prefetch = 0 : i64, scratch_operands = 0 : i64, tpu.core_type = #tpu.core_type<tc>, window_params = [{transform_indices = @transform_0, window_bounds = array<i64: 1, 16, 32>}, {pipeline_mode = #tpu.pipeline_mode<synchronous>, transform_indices = @transform_1, window_bounds = array<i64: 1, 32>}, {pipeline_mode = #tpu.pipeline_mode<synchronous>, transform_indices = @transform_2, window_bounds = array<i64: 1, 32>}, {pipeline_mode = #tpu.pipeline_mode<synchronous>, transform_indices = @transform_3, window_bounds = array<i64: 32, 96>}, {pipeline_mode = #tpu.pipeline_mode<synchronous>, transform_indices = @transform_4, window_bounds = array<i64: 1, 96>}, {transform_indices = @transform_5, window_bounds = array<i64: 1, 2, 16, 16>}, {transform_indices = @transform_6, window_bounds = array<i64: 1, 2, 16, 16>}, {transform_indices = @transform_7, window_bounds = array<i64: 1, 2, 16, 16>}]} {
    %c0 = arith.constant 0 : index
    %c0_0 = arith.constant 0 : index
    %c0_1 = arith.constant 0 : index
    %0 = vector.load %arg2[%c0, %c0_0, %c0_1] : memref<1x16x32xbf16, #tpu.memory_space<vmem>>, vector<1x16x32xbf16>
    %1 = vector.shape_cast %0 : vector<1x16x32xbf16> to vector<16x32xbf16>
    %2 = arith.extf %1 : vector<16x32xbf16> to vector<16x32xf32>
    %c0_2 = arith.constant 0 : index
    %c0_3 = arith.constant 0 : index
    %3 = vector.load %arg3[%c0_2, %c0_3] : memref<1x32xf32, #tpu.memory_space<vmem>>, vector<1x32xf32>
    %c0_4 = arith.constant 0 : index
    %c0_5 = arith.constant 0 : index
    %4 = vector.load %arg4[%c0_4, %c0_5] : memref<1x32xf32, #tpu.memory_space<vmem>>, vector<1x32xf32>
    %cst = arith.constant dense<0.000000e+00> : vector<16xf32>
    %5 = vector.multi_reduction <add>, %2, %cst [1] : vector<16x32xf32> to vector<16xf32>
    %6 = vector.shape_cast %5 : vector<16xf32> to vector<16x1xf32>
    %cst_6 = arith.constant 3.200000e+01 : f32
    %7 = vector.broadcast %cst_6 : f32 to vector<16x1xf32>
    %8 = arith.divf %6, %7 : vector<16x1xf32>
    %9 = vector.broadcast %8 : vector<16x1xf32> to vector<16x32xf32>
    %10 = arith.subf %2, %9 : vector<16x32xf32>
    %11 = arith.mulf %10, %10 : vector<16x32xf32>
    %cst_7 = arith.constant dense<0.000000e+00> : vector<16xf32>
    %12 = vector.multi_reduction <add>, %11, %cst_7 [1] : vector<16x32xf32> to vector<16xf32>
    %13 = vector.shape_cast %12 : vector<16xf32> to vector<16x1xf32>
    %cst_8 = arith.constant 3.200000e+01 : f32
    %14 = vector.broadcast %cst_8 : f32 to vector<16x1xf32>
    %15 = arith.divf %13, %14 : vector<16x1xf32>
    %16 = vector.broadcast %8 : vector<16x1xf32> to vector<16x32xf32>
    %17 = arith.subf %2, %16 : vector<16x32xf32>
    %cst_9 = arith.constant 9.99999974E-6 : f32
    %18 = vector.broadcast %cst_9 : f32 to vector<16x1xf32>
    %19 = arith.addf %15, %18 : vector<16x1xf32>
    %20 = math.rsqrt %19 : vector<16x1xf32>
    %21 = vector.broadcast %20 : vector<16x1xf32> to vector<16x32xf32>
    %22 = arith.mulf %17, %21 : vector<16x32xf32>
    %23 = vector.broadcast %3 : vector<1x32xf32> to vector<16x32xf32>
    %24 = arith.mulf %22, %23 : vector<16x32xf32>
    %25 = vector.broadcast %4 : vector<1x32xf32> to vector<16x32xf32>
    %26 = arith.addf %24, %25 : vector<16x32xf32>
    %27 = arith.truncf %26 : vector<16x32xf32> to vector<16x32xbf16>
    %c0_10 = arith.constant 0 : index
    %c0_11 = arith.constant 0 : index
    %28 = vector.load %arg5[%c0_10, %c0_11] : memref<32x96xbf16, #tpu.memory_space<vmem>>, vector<32x96xbf16>
    %cst_12 = arith.constant dense<0.000000e+00> : vector<16x96xf32>
    %29 = tpu.matmul %27, %28, %cst_12 {dimension_numbers = #tpu.dot_dimension_numbers<[1], [0], [0], [1], [0, 0, 1, 1], [], []>} : vector<16x32xbf16>, vector<32x96xbf16>, vector<16x96xf32> -> vector<16x96xf32>
    %c0_13 = arith.constant 0 : index
    %c0_14 = arith.constant 0 : index
    %30 = vector.load %arg6[%c0_13, %c0_14] : memref<1x96xf32, #tpu.memory_space<vmem>>, vector<1x96xf32>
    %31 = vector.broadcast %30 : vector<1x96xf32> to vector<16x96xf32>
    %32 = arith.addf %29, %31 : vector<16x96xf32>
    %33 = vector.extract_strided_slice %32 {offsets = [0, 0], sizes = [16, 16], strides = [1, 1]} : vector<16x96xf32> to vector<16x16xf32>
    %34 = vector.extract_strided_slice %32 {offsets = [0, 16], sizes = [16, 16], strides = [1, 1]} : vector<16x96xf32> to vector<16x16xf32>
    %35 = vector.shape_cast %33 : vector<16x16xf32> to vector<1x16x16xf32>
    %36 = vector.shape_cast %34 : vector<16x16xf32> to vector<1x16x16xf32>
    %37 = tpu.concatenate %35, %36 in 0 : vector<1x16x16xf32>, vector<1x16x16xf32> -> vector<2x16x16xf32>
    %38 = arith.truncf %37 : vector<2x16x16xf32> to vector<2x16x16xbf16>
    %c0_15 = arith.constant 0 : index
    %c0_16 = arith.constant 0 : index
    %c0_17 = arith.constant 0 : index
    %c0_18 = arith.constant 0 : index
    %39 = vector.load %arg7[%c0_15, %c0_16, %c0_17, %c0_18] : memref<1x2x16x16xbf16, #tpu.memory_space<vmem>>, vector<1x2x16x16xbf16>
    %40 = vector.shape_cast %39 : vector<1x2x16x16xbf16> to vector<2x16x16xbf16>
    %41 = vector.shape_cast %38 : vector<2x16x16xbf16> to vector<1x2x16x16xbf16>
    tpu.vector_store %arg7[%c0_15, %c0_16, %c0_17, %c0_18], %41 {strides = array<i32>} : memref<1x2x16x16xbf16, #tpu.memory_space<vmem>>, vector<1x2x16x16xbf16>,
    %42 = vector.extract_strided_slice %32 {offsets = [0, 32], sizes = [16, 16], strides = [1, 1]} : vector<16x96xf32> to vector<16x16xf32>
    %43 = vector.extract_strided_slice %32 {offsets = [0, 48], sizes = [16, 16], strides = [1, 1]} : vector<16x96xf32> to vector<16x16xf32>
    %44 = vector.shape_cast %42 : vector<16x16xf32> to vector<1x16x16xf32>
    %45 = vector.shape_cast %43 : vector<16x16xf32> to vector<1x16x16xf32>
    %46 = tpu.concatenate %44, %45 in 0 : vector<1x16x16xf32>, vector<1x16x16xf32> -> vector<2x16x16xf32>
    %47 = arith.truncf %46 : vector<2x16x16xf32> to vector<2x16x16xbf16>
    %c0_19 = arith.constant 0 : index
    %c0_20 = arith.constant 0 : index
    %c0_21 = arith.constant 0 : index
    %c0_22 = arith.constant 0 : index
    %48 = vector.load %arg8[%c0_19, %c0_20, %c0_21, %c0_22] : memref<1x2x16x16xbf16, #tpu.memory_space<vmem>>, vector<1x2x16x16xbf16>
    %49 = vector.shape_cast %48 : vector<1x2x16x16xbf16> to vector<2x16x16xbf16>
    %50 = vector.shape_cast %47 : vector<2x16x16xbf16> to vector<1x2x16x16xbf16>
    tpu.vector_store %arg8[%c0_19, %c0_20, %c0_21, %c0_22], %50 {strides = array<i32>} : memref<1x2x16x16xbf16, #tpu.memory_space<vmem>>, vector<1x2x16x16xbf16>,
    %51 = vector.extract_strided_slice %32 {offsets = [0, 64], sizes = [16, 16], strides = [1, 1]} : vector<16x96xf32> to vector<16x16xf32>
    %52 = vector.extract_strided_slice %32 {offsets = [0, 80], sizes = [16, 16], strides = [1, 1]} : vector<16x96xf32> to vector<16x16xf32>
    %53 = vector.shape_cast %51 : vector<16x16xf32> to vector<1x16x16xf32>
    %54 = vector.shape_cast %52 : vector<16x16xf32> to vector<1x16x16xf32>
    %55 = tpu.concatenate %53, %54 in 0 : vector<1x16x16xf32>, vector<1x16x16xf32> -> vector<2x16x16xf32>
    %56 = arith.truncf %55 : vector<2x16x16xf32> to vector<2x16x16xbf16>
    %c0_23 = arith.constant 0 : index
    %c0_24 = arith.constant 0 : index
    %c0_25 = arith.constant 0 : index
    %c0_26 = arith.constant 0 : index
    %57 = vector.load %arg9[%c0_23, %c0_24, %c0_25, %c0_26] : memref<1x2x16x16xbf16, #tpu.memory_space<vmem>>, vector<1x2x16x16xbf16>
    %58 = vector.shape_cast %57 : vector<1x2x16x16xbf16> to vector<2x16x16xbf16>
    %59 = vector.shape_cast %56 : vector<2x16x16xbf16> to vector<1x2x16x16xbf16>
    tpu.vector_store %arg9[%c0_23, %c0_24, %c0_25, %c0_26], %59 {strides = array<i32>} : memref<1x2x16x16xbf16, #tpu.memory_space<vmem>>, vector<1x2x16x16xbf16>,
    return
  }
  func.func @transform_0(%arg0: i32, %arg1: i32) -> (i32, i32, i32) {
    %c0_i32 = arith.constant 0 : i32
    %c0_i32_0 = arith.constant 0 : i32
    return %arg0, %arg1, %c0_i32 : i32, i32, i32
  }
  func.func @transform_1(%arg0: i32, %arg1: i32) -> (i32, i32) {
    %c0_i32 = arith.constant 0 : i32
    %c0_i32_0 = arith.constant 0 : i32
    %c0_i32_1 = arith.constant 0 : i32
    return %c0_i32, %c0_i32_0 : i32, i32
  }
  func.func @transform_2(%arg0: i32, %arg1: i32) -> (i32, i32) {
    %c0_i32 = arith.constant 0 : i32
    %c0_i32_0 = arith.constant 0 : i32
    %c0_i32_1 = arith.constant 0 : i32
    return %c0_i32, %c0_i32_0 : i32, i32
  }
  func.func @transform_3(%arg0: i32, %arg1: i32) -> (i32, i32) {
    %c0_i32 = arith.constant 0 : i32
    %c0_i32_0 = arith.constant 0 : i32
    %c0_i32_1 = arith.constant 0 : i32
    return %c0_i32, %c0_i32_0 : i32, i32
  }
  func.func @transform_4(%arg0: i32, %arg1: i32) -> (i32, i32) {
    %c0_i32 = arith.constant 0 : i32
    %c0_i32_0 = arith.constant 0 : i32
    %c0_i32_1 = arith.constant 0 : i32
    return %c0_i32, %c0_i32_0 : i32, i32
  }
  func.func @transform_5(%arg0: i32, %arg1: i32) -> (i32, i32, i32, i32) {
    %c0_i32 = arith.constant 0 : i32
    %c0_i32_0 = arith.constant 0 : i32
    %c0_i32_1 = arith.constant 0 : i32
    return %arg0, %c0_i32, %arg1, %c0_i32_0 : i32, i32, i32, i32
  }
  func.func @transform_6(%arg0: i32, %arg1: i32) -> (i32, i32, i32, i32) {
    %c0_i32 = arith.constant 0 : i32
    %c0_i32_0 = arith.constant 0 : i32
    %c0_i32_1 = arith.constant 0 : i32
    return %arg0, %c0_i32, %arg1, %c0_i32_0 : i32, i32, i32, i32
  }
  func.func @transform_7(%arg0: i32, %arg1: i32) -> (i32, i32, i32, i32) {
    %c0_i32 = arith.constant 0 : i32
    %c0_i32_0 = arith.constant 0 : i32
    %c0_i32_1 = arith.constant 0 : i32
    return %arg0, %c0_i32, %arg1, %c0_i32_0 : i32, i32, i32, i32
  }
}

</mosaic_0001>

<bundles_post_ra>
// kernel: tpu_custom_call.1
= control target key start
LH: loop header
LB: loop body
LE: loop exit
PB: predicated region body
PF: predicated region fallthrough
CT: control target
= control target key end

     0   :  { %s1533_s0 = inlined_call_operand.hbm [shape: bf16[2,16,32], index: 0, kind: input, shape index: {}]   ;;  %s1534_s1 = inlined_call_operand.vmem [shape: f32[1,32], index: 1, kind: input, shape index: {}]   ;;  %s1535_s2 = inlined_call_operand.vmem [shape: f32[1,32], index: 2, kind: input, shape index: {}]   ;;  %s1536_s3 = inlined_call_operand.hbm [shape: bf16[32,96], index: 3, kind: input, shape index: {}]   ;;  %s1537_s4 = inlined_call_operand.vmem [shape: f32[1,96], index: 4, kind: input, shape index: {}]   ;;  %s1538_s5 = inlined_call_operand.hbm [shape: bf16[2,2,16,16], index: 5, kind: output, shape index: {0}]   ;;  %s1539_s6 = inlined_call_operand.hbm [shape: bf16[2,2,16,16], index: 6, kind: output, shape index: {1}]   ;;  %s1540_s7 = inlined_call_operand.hbm [shape: bf16[2,2,16,16], index: 7, kind: output, shape index: {2}]  }
   0x1   :  { %1549 = sst [smem:[#allocation15_spill]] %s1533_s0 }
   0x2   :  { %1550 = sst [smem:[#allocation16_spill]] %s1536_s3 }
   0x3   :  { %13 = vsyncpa [#allocation3], 0 }
   0x4   :  { %15 = vsyncpa [#allocation3 + $0x1], 0 }
   0x5   :  { %16 = vsyncpa [#allocation6], 0 }
   0x6   :  { %17 = vsyncpa [#allocation4], 0 }
   0x7   :  { %19 = vsyncpa [#allocation4 + $0x1], 0 }
   0x8   :  { %20 = vsyncpa [#allocation9], 0 }
   0x9   :  { %22 = vsyncpa [#allocation9 + $0x1], 0  ;;  %s1181_s24 = smov 0   ;;  %s1183_s25 = smov 0  }
   0xa   :  { %s1185_s26 = smov 0   ;;  %s1187_s27 = smov 0  }
   0xb   :  { %s1189_s28 = smov 0   ;;  %s1191_s29 = smov 0  }
   0xc LB: > { %s1212_s30 = sadd.s32 4294967295, %s1126_s29   ;;  %s1544_s8 = sadd.s32 4294967294, %s1126_s29   ;;  %s1126_s29 = sphi %s1191_s29, %s28_s29   ;;  %s1122_s28 = sphi %s1189_s28, %s1576_s28   ;;  %s1118_s27 = sphi %s1187_s27, %s1575_s27   ;;  %s1114_s26 = sphi %s1185_s26, %s1574_s26   ;;  %s1110_s25 = sphi %s1183_s25, %s1573_s25   ;;  %s1106_s24 = sphi %s1181_s24, %s1572_s24  }
   0xd   : > { %p62_p0 = scmp.ne.s32.totalorder %s1110_s25, %s1106_s24  ;;  %p1541_p1 = scmp.eq.s32.totalorder %s1212_s30, 0 }
   0xe   : > { %p178_p3 = scmp.eq.s32.totalorder %s1544_s8, 1  ;;  %p764_p5 = scmp.ge.s32.totalorder %s1126_s29, 1 }
   0xf   : > { %p1223_p4 = por %p1541_p1, %p62_p0  ;;  %p241_p7 = scmp.lt.s32.totalorder %s1126_s29, 3 }
  0x10   : > { %p1228_p6 = por %p178_p3, %p62_p0  ;;  %s1128_s12 = smov [#allocation5]  }
  0x11   : > { %s1551_s9 = scalar_select %p1223_p4, 1, 0 }
  0x12   : > { %s1552_s10 = scalar_select %p1228_p6, 1, 0 }
  0x13   : > { %p1233_p8 = pnand %p764_p5, %p241_p7  ;;  %s259_s13 = sshll.u32 %s1128_s12, 4  ;;  %s260_s13 = int_to_ptr.vmem [resolvable:$true] %s259_s13 }
  0x14   : > { %s40_s15 = sadd.s32 1, %s1122_s28  ;;  %s1555_s3 = sld [smem:[#allocation16_spill]] }
  0x15   : > { %s1553_s11 = scalar_select %p1233_p8, 1, 0 }
  0x16   : > { %p832_p9 = pneg %p1233_p8 }
  0x18   : > { %p1242_p11 = pnand %p832_p9, %p1541_p1 }
  0x1a   : > { %s922_s18 = scalar_lea.hbm %s1555_s3, 256  ;;  %p924_p13 = pneg %p1242_p11 }
  0x1b   : > { %p923_p12 = scmp.ne.s32.totalorder %s1555_s3, %s922_s18  ;;  %p929_p5 = scmp.lt.u32.totalorder %s922_s18, %s1555_s3 }
  0x1d   : > { %p925_p0 = pnand %p924_p13, %p923_p12 }
  0x1f   : > { %p926_p3 = pneg %p925_p0 }
  0x21   : > { %p931_p7 = pnand %p929_p5, %p926_p3 }
  0x23   : > { %934 = shalt.err (!%p931_p7)
}
  0x24   : > { %s935_s23 = scalar_lea.vmem %s260_s13, 256  ;;  %p943_p2 = scmp.lt.s32.totalorder %s260_s13, %s260_s13 }
  0x25   : > { %p936_p9 = scmp.ne.s32.totalorder %s260_s13, %s935_s23  ;;  %p944_p6 = scmp.lt.s32.totalorder %s935_s23, %s935_s23 }
  0x27   : > { %p938_p10 = pnand %p936_p9, %p924_p13  ;;  %p945_p4 = por %p944_p6, %p943_p2 }
  0x29   : > { %p939_p1 = pneg %p938_p10 }
  0x2b   : > { %p946_p8 = pnand %p945_p4, %p939_p1 }
  0x2d   : > { %949 = shalt.err (!%p946_p8)
}
  0x2e   : > { %s1545_s12 = smov 64   ;;  %s1546_s16 = smov 4  }
  0x2f   : > { %835 = dma.hbm_to_vmem [thread:$0]  (!%p1242_p11), %s1555_s3, 256, %s260_s13, [#allocation6], %s1545_s12, %s1545_s12, %s1546_s16  }
  0x30   : > { %p42_p1 = scmp.ge.s32.totalorder %s40_s15, 2  ;;  %s49_s19 = sadd.s32 1, %s1114_s26 }
  0x31   : > { %p56_p2 = scmp.ne.s32.totalorder %s1114_s26, %s1110_s25  ;;  %p57_p4 = scmp.eq.s32.totalorder %s1126_s29, 0 }
  0x32   : > { %s1578_s15 = smov (%p42_p1, %s40_s15), 0  ;;  %p1557_p8 = scmp.eq.s32.totalorder %s1212_s30, 1 }
  0x33   : > { %p1272_p6 = por %p57_p4, %p56_p2  ;;  %s44_s21 = ssub.s32 %s1122_s28, %s1578_s15 }
  0x34   : > { %p1278_p10 = por %p1557_p8, %p56_p2  ;;  %p851_p12 = scmp.lt.s32.totalorder %s1126_s29, 2 }
  0x35   : > { %p47_p11 = scmp.eq.s32.totalorder %s44_s21, 0  ;;  %s276_s13 = sand.u32 1, %s1114_s26  }
  0x36   : > { %s767_s22 = sshll.u32 %s276_s13, 3  ;;  %s797_s17 = sshll.u32 %s1122_s28, 7 }
  0x37   : > { %s1287_s23 = scalar_select %p47_p11, %s1114_s26, %s49_s19  }
  0x38   : > { %s1559_s0 = sld [smem:[#allocation15_spill]]  ;;  %s280_s16 = scalar_lea.vmem [#allocation2], %s767_s22 }
  0x39   : > { %s289_s3 = sshll.u32 %s280_s16, 4  ;;  %p1299_p13 = pnand %p851_p12, %p1272_p6  ;;  %s1295_s3 = int_to_ptr.vmem [resolvable:$true] %s289_s3 }
  0x3a   : > { %s1303_s19 = scalar_lea.sflag [#allocation3], %s276_s13 }
  0x3b   : > { %p952_p3 = pneg %p1299_p13 }
  0x3e   : > { %s1293_s12 = scalar_lea.hbm %s1559_s0, %s797_s17  ;;  %s955_s20 = scalar_lea.hbm %s1559_s0, 256 }
  0x3f   : > { %s950_s8 = scalar_lea.hbm %s1293_s12, 128  ;;  %p956_p9 = scmp.lt.u32.totalorder %s1293_s12, %s1559_s0 }
  0x40   : > { %p951_p0 = scmp.ne.s32.totalorder %s1293_s12, %s950_s8  ;;  %p957_p1 = scmp.lt.u32.totalorder %s955_s20, %s950_s8 }
  0x41   : > { %p959_p4 = scmp.lt.u32.totalorder %s950_s8, %s1293_s12 }
  0x42   : > { %p953_p5 = pnand %p952_p3, %p951_p0  ;;  %p958_p2 = por %p957_p1, %p956_p9 }
  0x44   : > { %p954_p7 = pneg %p953_p5  ;;  %p960_p6 = por %p959_p4, %p958_p2 }
  0x46   : > { %p961_p8 = pnand %p960_p6, %p954_p7 }
  0x48   : > { %964 = shalt.err (!%p961_p8)
}
  0x49   : > { %s965_s13 = scalar_lea.vmem %s1295_s3, 128  ;;  %s1131_s16 = smov [#allocation2]  }
  0x4a   : > { %p966_p12 = scmp.ne.s32.totalorder %s1295_s3, %s965_s13  ;;  %s970_s22 = sshll.u32 %s1131_s16, 4  ;;  %s971_s22 = int_to_ptr.vmem [resolvable:$false] %s970_s22 }
  0x4b   : > { %s972_s17 = scalar_lea.vmem %s971_s22, 256  ;;  %p973_p5 = scmp.lt.s32.totalorder %s1295_s3, %s971_s22 }
  0x4c   : > { %p968_p11 = pnand %p966_p12, %p952_p3  ;;  %p974_p9 = scmp.lt.s32.totalorder %s972_s17, %s965_s13 }
  0x4e   : > { %p969_p0 = pneg %p968_p11  ;;  %p975_p1 = por %p974_p9, %p973_p5 }
  0x50   : > { %p976_p2 = pnand %p975_p1, %p969_p0 }
  0x52   : > { %979 = shalt.err (!%p976_p2)
}
  0x53   : > { %s1561_s8 = smov 4   ;;  %s1562_s20 = smov 64  }
  0x54   : > { %839 = dma.hbm_to_vmem [thread:$0]  (!%p1299_p13), %s1293_s12, 128, %s1295_s3, %s1303_s19, %s1562_s20, %s1562_s20, %s1561_s8  }
  0x55   : > { %p1563_p3 = scmp.ne.s32.totalorder %s1553_s11, 0 }
  0x56   : > { %s1337_s18 = sand.u32 (!%p1563_p3), 1, %s1110_s25   ;;  %p1564_p7 = scmp.ne.s32.totalorder (!%p1563_p3), %s1551_s9, 0 }
  0x57   : > { %301 = sbr.rel (%p1563_p3) target bundleno = 909 (0x38d), region = 40  ;;  %s771_s13 = sshll.u32 (!%p1563_p3), %s1337_s18, 3 }
  0x58   : > { %s304_s16 = scalar_lea.sflag (!%p1563_p3), [#allocation3], %s1337_s18  ;;  %s307_s22 = scalar_lea.vmem (!%p1563_p3), [#allocation2], %s771_s13 }
  0x5e   : > { %1089 = dma.done.wait (%p1564_p7), %s304_s16, 128  }
  0x5f   : > { %1091 = vsyncadd (%p1564_p7), %s304_s16, 4294967168  ;;  %p1565_p4 = scmp.eq.s32.totalorder %s1212_s30, 0 }
  0x61   : > { %1093 = dma.done.wait (%p1565_p4), [#allocation6], 256   ;;  %p1566_p13 = pmov %p1565_p4 }
  0x62   : > { %v806_v0 = vld [vmem:[%s307_s22] sm:$0xff]   ;;  %vm363_vm0 = vcmask 261120   ;;  %v916_v15 = vld [vmem:[#allocation5] sm:$0xff]   ;;  %v1132_v16 = vmov 0.0   ;;  %v917_v17 = vld [vmem:[#allocation5 + $0x8] sm:$0xff]   ;;  %vm1133_vm1 = vmmov 0  }
  0x63   : > { %1095 = vsyncadd (%p1566_p13), [#allocation6], 4294967040  ;;  %v807_v1 = vunpack.c.l.bf16 %v806_v0  ;;  %v808_v2 = vunpack.c.h.bf16 %v806_v0  ;;  %812 = vmatprep.subr.bf16.mxu0 %v1132_v16  ;;  %816 = vmatprep.mubr.msk.bf16.mxu0 %vm1133_vm1, %v1132_v16  ;;  %v776_v26 = vld [vmem:[%s1534_s1] ss:$0 sm:$0xff]  ;;  %s1364_s17 = sshll.u32 %s1337_s18, 4  ;;  %vm499_vm2 = vcmask 125952  }
  0x64   : > { %813 = vmatpush3.bf16.msra.mxu0 %v916_v15  ;;  %v777_v30 = vld [vmem:[%s1535_s2] ss:$0 sm:$0xff]  ;;  %s337_s8 = scalar_lea.vmem [#allocation7], %s1364_s17  ;;  %s1134_s20 = smov 96  }
  0x65   : > { %v364_v3 = vsel %vm363_vm0, %v807_v1, 0.0  ;;  %v367_v4 = vsel %vm363_vm0, %v808_v2, 0.0  ;;  %814 = vmatprep.subr.bf16.mxu0 %v1132_v16  ;;  %v778_v35 = vld [vmem:[%s1537_s4] ss:$0 sm:$0xff]  ;;  %s1135_s13 = smov 112   ;;  %s1547_s16 = smov 64  }
  0x66   : > { %365 = vadd.xlane.f32.xlu0 %v364_v3  ;;  %s562_s22 = sshll.u32 %s337_s8, 4  ;;  %s1372_s3 = scalar_lea.vmem [#allocation8], %s1364_s17  ;;  %s1379_s22 = int_to_ptr.vmem [resolvable:$true] %s562_s22 }
  0x67   : > { %s1377_s9 = sshll.u32 %s1118_s27, 8  ;;  %s1382_s11 = scalar_lea.vmem [#allocation10], %s1364_s17 }
  0x68   : > { %815 = vmatpush3.bf16.msra.mxu0 %v917_v17  ;;  %s1390_s21 = scalar_lea.hbm %s1538_s5, %s1377_s9  ;;  %s980_s17 = scalar_lea.vmem %s1379_s22, 256 }
  0x69   : > { %p981_p6 = scmp.ne.s32.totalorder %s1379_s22, %s980_s17 }
  0x6a   : > { %368 = vadd.xlane.f32.xlu0 %v367_v4 }
  0x6b   : > { %p982_p8 = pnand %p981_p6, %p1278_p10 }
  0x6d   : > { %p983_p12 = pneg %p982_p8 }
  0xf3   : > { %v366_v5 = vpop.xlane.xlu0 %365 }
  0xf4   : > { %v371_v6 = vmul.f32 0.03125, %v366_v5 }
  0xf6   : > { %v373_v7 = vsub.f32 %v807_v1, %v371_v6 }
  0xf7   : > { %v369_v8 = vpop.xlane.xlu0 %368 }
  0xf8   : > { %v372_v9 = vmul.f32 0.03125, %v369_v8  ;;  %v375_v10 = vmul.f32 %v373_v7, %v373_v7 }
  0xfa   : > { %v374_v11 = vsub.f32 %v808_v2, %v372_v9  ;;  %v377_v12 = vsel %vm363_vm0, %v375_v10, 0.0 }
  0xfb   : > { %378 = vadd.xlane.f32.xlu1 %v377_v12 }
  0xfc   : > { %v376_v13 = vmul.f32 %v374_v11, %v374_v11 }
  0xfe   : > { %v380_v14 = vsel %vm363_vm0, %v376_v13, 0.0 }
  0xff   : > { %381 = vadd.xlane.f32.xlu1 %v380_v14 }
 0x188   : > { %v379_v18 = vpop.xlane.xlu1 %378 }
 0x189   : > { %v383_v19 = vmul.f32 0.03125, %v379_v18 }
 0x18b   : > { %v385_v20 = vadd.f32 1e-05, %v383_v19 }
 0x18c   : > { %v382_v21 = vpop.xlane.xlu1 %381 }
 0x18d   : > { %918 = vrsqrt.f32 %v385_v20  ;;  %v384_v22 = vmul.f32 0.03125, %v382_v21 }
 0x18f   : > { %v386_v23 = vadd.f32 1e-05, %v384_v22 }
 0x191   : > { %920 = vrsqrt.f32 %v386_v23 }
 0x197   : > { %v919_v24 = vpop.eup %918 }
 0x198   : > { %v389_v25 = vmul.f32 %v919_v24, %v373_v7 }
 0x19a   : > { %v397_v29 = vmul.f32 %v776_v26, %v389_v25 }
 0x19b   : > { %v921_v27 = vpop.eup %920 }
 0x19c   : > { %v390_v28 = vmul.f32 %v921_v27, %v374_v11  ;;  %v405_v32 = vadd.f32 %v777_v30, %v397_v29 }
 0x19e   : > { %v398_v31 = vmul.f32 %v776_v26, %v390_v28 }
 0x1a0   : > { %v406_v33 = vadd.f32 %v777_v30, %v398_v31 }
 0x1a2   : > { %v407_v34 = vpack.c.bf16 %v406_v33, %v405_v32 }
 0x1a4   : > { %817 = vmatmul.mubr.msk.bf16.vlgmr.msra.gmra.mrb[0].mxu0 %vm363_vm0, %v407_v34 }
 0x277   : > { %v468_v36 = vpop.f32.mrb[0].mxu0 }
 0x278   : > { %v469_v37 = vadd.f32 %v778_v35, %v468_v36  ;;  %v818_v38 = vpop.f32.mrb[1].mxu0 }
 0x279   : > { %v471_v39 = vpop.f32.mrb[2].mxu0 }
 0x27a   : > { %v798_v40 = vpack.c.bf16 %v469_v37, %v469_v37  ;;  %v472_v41 = vadd.f32 %v778_v35, %v471_v39  ;;  %v819_v42 = vpop.f32.mrb[3].mxu0 }
 0x27c   : > { %500 = vst.msk [vmem:[%s337_s8] sm:$0xf] %vm499_vm2, %v798_v40  ;;  %v911_v43 = vpack.i.bf16 %v472_v41, %v469_v37  ;;  %v799_v44 = vpack.c.bf16 %v472_v41, %v472_v41  ;;  %504 = vrot.lane.b32.xlu1 %v798_v40, %s1134_s20 }
 0x27e   : > { %501 = vst.msk [vmem:[%s337_s8 + $0x4] sm:$0xf] %vm499_vm2, %v799_v44  ;;  %912 = vrot.lane.b32.xlu0 %v911_v43, %s1135_s13  ;;  %s1137_s13 = smov [#allocation7]  }
 0x27f   : > { %s984_s27 = sshll.u32 %s1137_s13, 4  ;;  %s985_s27 = int_to_ptr.vmem [resolvable:$false] %s984_s27 }
 0x280   : > { %520 = vrot.lane.b32.xlu1 %v798_v40, %s1547_s16  ;;  %s986_s12 = scalar_lea.vmem %s985_s27, 512  ;;  %p987_p11 = scmp.lt.s32.totalorder %s1379_s22, %s985_s27 }
 0x281   : > { %p988_p0 = scmp.lt.s32.totalorder %s986_s12, %s980_s17 }
 0x282   : > { %522 = vrot.lane.b32.xlu0 %v799_v44, %s1547_s16 }
 0x283   : > { %p989_p5 = por %p988_p0, %p987_p11 }
 0x284   : > { %506 = vrot.lane.b32.xlu1 %v799_v44, %s1134_s20 }
 0x285   : > { %p990_p9 = pnand %p989_p5, %p983_p12 }
 0x2ee   : > { %v505_v45 = vpop.permute.xlu1 %504 }
 0x2ef   : > { %516 = vst.msk [vmem:[%s1372_s3] sm:$0xf] %vm499_vm2, %v505_v45 }
 0x2f0   : > { %v913_v46 = vpop.permute.xlu0 %912 }
 0x2f1   : > { %v915_v47 = vunpack.i.h.bf16 %v913_v46  ;;  %v914_v48 = vunpack.i.l.bf16 %v913_v46 }
 0x2f2   : > { %v521_v49 = vpop.permute.xlu1 %520 }
 0x2f3   : > { %v801_v50 = vpack.c.bf16 %v915_v47, %v915_v47  ;;  %v800_v51 = vpack.c.bf16 %v914_v48, %v914_v48  ;;  %532 = vst.msk [vmem:[%s1382_s11] sm:$0xf] %vm499_vm2, %v521_v49 }
 0x2f4   : > { %v523_v52 = vpop.permute.xlu0 %522 }
 0x2f5   : > { %503 = vst.msk [vmem:[%s337_s8 + $0xc] sm:$0xf] %vm499_vm2, %v801_v50  ;;  %502 = vst.msk [vmem:[%s337_s8 + $0x8] sm:$0xf] %vm499_vm2, %v800_v51  ;;  %510 = vrot.lane.b32.xlu0 %v801_v50, %s1134_s20  ;;  %508 = vrot.lane.b32.xlu1 %v800_v51, %s1134_s20 }
 0x2f6   : > { %533 = vst.msk [vmem:[%s1382_s11 + $0x4] sm:$0xf] %vm499_vm2, %v523_v52  ;;  %v507_v53 = vpop.permute.xlu1 %506 }
 0x2f7   : > { %993 = shalt.err (!%p990_p9)
}
 0x2f8   : > { %s994_s8 = scalar_lea.hbm %s1390_s21, 256  ;;  %s998_s13 = scalar_lea.hbm %s1538_s5, 512 }
 0x2f9   : > { %p995_p1 = scmp.ne.s32.totalorder %s1390_s21, %s994_s8  ;;  %p999_p7 = scmp.lt.u32.totalorder %s1390_s21, %s1538_s5 }
 0x2fa   : > { %p1000_p4 = scmp.lt.u32.totalorder %s998_s13, %s994_s8  ;;  %p1002_p6 = scmp.lt.u32.totalorder %s994_s8, %s1390_s21 }
 0x2fb   : > { %p996_p2 = pnand %p995_p1, %p1278_p10 }
 0x2fc   : > { %p1001_p13 = por %p1000_p4, %p999_p7 }
 0x2fd   : > { %p997_p3 = pneg %p996_p2 }
 0x2fe   : > { %p1003_p8 = por %p1002_p6, %p1001_p13 }
 0x300   : > { %p1004_p12 = pnand %p1003_p8, %p997_p3 }
 0x302   : > { %1007 = shalt.err (!%p1004_p12)
}
 0x303   : > { %s1138_s17 = smov 4   ;;  %s1567_s12 = smov 64   ;;  %517 = vst.msk [vmem:[%s1372_s3 + $0x4] sm:$0xf] %vm499_vm2, %v507_v53 }
 0x304   : > { %s1568_s0 = scalar_lea.sflag [#allocation4], %s1337_s18  ;;  %526 = vrot.lane.b32.xlu0 %v801_v50, %s1567_s12  ;;  %524 = vrot.lane.b32.xlu1 %v800_v51, %s1567_s12  ;;  %s580_s16 = sshll.u32 %s1372_s3, 4  ;;  %s1429_s16 = int_to_ptr.vmem [resolvable:$true] %s580_s16 }
 0x305   : > { %826 = dma.vmem_to_hbm [thread:$0]  (%p1278_p10), %s1379_s22, 256, %s1390_s21, %s1568_s0, %s1567_s12, %s1567_s12, %s1138_s17  }
 0x306   : > { %s541_s19 = sand.u32 1, %s1212_s30   ;;  %s1435_s20 = scalar_lea.hbm %s1539_s6, %s1377_s9 }
 0x307   : > { %s598_s0 = sshll.u32 %s1382_s11, 4  ;;  %s1442_s22 = scalar_lea.sflag [#allocation9], %s541_s19  ;;  %s1471_s0 = int_to_ptr.vmem [resolvable:$true] %s598_s0 }
 0x308   : > { %s1008_s30 = scalar_lea.vmem %s1429_s16, 256  ;;  %s1139_s21 = smov [#allocation8]  }
 0x309   : > { %p1009_p11 = scmp.ne.s32.totalorder %s1429_s16, %s1008_s30  ;;  %s1012_s13 = sshll.u32 %s1139_s21, 4  ;;  %s1013_s13 = int_to_ptr.vmem [resolvable:$false] %s1012_s13 }
 0x30a   : > { %s1014_s27 = scalar_lea.vmem %s1013_s13, 512  ;;  %p1015_p9 = scmp.lt.s32.totalorder %s1429_s16, %s1013_s13 }
 0x30b   : > { %p1010_p0 = pnand %p1009_p11, %p1278_p10  ;;  %p1016_p1 = scmp.lt.s32.totalorder %s1014_s27, %s1008_s30 }
 0x30d   : > { %p1011_p5 = pneg %p1010_p0  ;;  %p1017_p2 = por %p1016_p1, %p1015_p9 }
 0x30f   : > { %p1018_p3 = pnand %p1017_p2, %p1011_p5 }
 0x367   : > { %v511_v54 = vpop.permute.xlu0 %510  ;;  %v509_v55 = vpop.permute.xlu1 %508 }
 0x368   : > { %519 = vst.msk [vmem:[%s1372_s3 + $0xc] sm:$0xf] %vm499_vm2, %v511_v54  ;;  %518 = vst.msk [vmem:[%s1372_s3 + $0x8] sm:$0xf] %vm499_vm2, %v509_v55 }
 0x369   : > { %1021 = shalt.err (!%p1018_p3)
}
 0x36a   : > { %s1022_s3 = scalar_lea.hbm %s1435_s20, 256  ;;  %s1026_s8 = scalar_lea.hbm %s1539_s6, 512 }
 0x36b   : > { %p1023_p7 = scmp.ne.s32.totalorder %s1435_s20, %s1022_s3  ;;  %p1027_p6 = scmp.lt.u32.totalorder %s1435_s20, %s1539_s6 }
 0x36c   : > { %p1028_p8 = scmp.lt.u32.totalorder %s1026_s8, %s1022_s3  ;;  %p1030_p11 = scmp.lt.u32.totalorder %s1022_s3, %s1435_s20 }
 0x36d   : > { %p1024_p4 = pnand %p1023_p7, %p1278_p10 }
 0x36e   : > { %p1029_p12 = por %p1028_p8, %p1027_p6 }
 0x36f   : > { %p1025_p13 = pneg %p1024_p4 }
 0x370   : > { %p1031_p0 = por %p1030_p11, %p1029_p12 }
 0x372   : > { %p1032_p5 = pnand %p1031_p0, %p1025_p13 }
 0x374   : > { %1035 = shalt.err (!%p1032_p5)
}
 0x375   : > { %827 = dma.vmem_to_hbm [thread:$0]  (%p1278_p10), %s1429_s16, 256, %s1435_s20, %s1442_s22, %s1567_s12, %s1567_s12, %s1138_s17  }
 0x376   : > { %s1477_s3 = scalar_lea.hbm %s1540_s7, %s1377_s9  ;;  %v527_v56 = vpop.permute.xlu0 %526  ;;  %v525_v57 = vpop.permute.xlu1 %524  ;;  %s1036_s19 = scalar_lea.vmem %s1471_s0, 256 }
 0x377   : > { %535 = vst.msk [vmem:[%s1382_s11 + $0xc] sm:$0xf] %vm499_vm2, %v527_v56  ;;  %534 = vst.msk [vmem:[%s1382_s11 + $0x8] sm:$0xf] %vm499_vm2, %v525_v57  ;;  %p1037_p9 = scmp.ne.s32.totalorder %s1471_s0, %s1036_s19  ;;  %s1140_s16 = smov [#allocation10]  }
 0x378   : > { %s1040_s20 = sshll.u32 %s1140_s16, 4  ;;  %s1041_s20 = int_to_ptr.vmem [resolvable:$false] %s1040_s20 }
 0x379   : > { %p1038_p1 = pnand %p1037_p9, %p1278_p10  ;;  %s1042_s18 = scalar_lea.vmem %s1041_s20, 512 }
 0x37a   : > { %p1043_p3 = scmp.lt.s32.totalorder %s1471_s0, %s1041_s20  ;;  %p1044_p7 = scmp.lt.s32.totalorder %s1042_s18, %s1036_s19 }
 0x37b   : > { %p1039_p2 = pneg %p1038_p1 }
 0x37c   : > { %p1045_p4 = por %p1044_p7, %p1043_p3 }
 0x37e   : > { %p1046_p13 = pnand %p1045_p4, %p1039_p2 }
 0x380   : > { %1049 = shalt.err (!%p1046_p13)
}
 0x381   : > { %s1050_s9 = scalar_lea.hbm %s1477_s3, 256  ;;  %s1054_s21 = scalar_lea.hbm %s1540_s7, 512 }
 0x382   : > { %p1051_p6 = scmp.ne.s32.totalorder %s1477_s3, %s1050_s9  ;;  %p1055_p11 = scmp.lt.u32.totalorder %s1477_s3, %s1540_s7 }
 0x383   : > { %p1056_p0 = scmp.lt.u32.totalorder %s1054_s21, %s1050_s9  ;;  %p1058_p9 = scmp.lt.u32.totalorder %s1050_s9, %s1477_s3 }
 0x384   : > { %p1052_p8 = pnand %p1051_p6, %p1278_p10 }
 0x385   : > { %p1057_p5 = por %p1056_p0, %p1055_p11 }
 0x386   : > { %p1053_p12 = pneg %p1052_p8 }
 0x387   : > { %p1059_p1 = por %p1058_p9, %p1057_p5 }
 0x389   : > { %p1060_p2 = pnand %p1059_p1, %p1053_p12 }
 0x38b   : > { %1063 = shalt.err (!%p1060_p2)
}
 0x38c   : > { %828 = dma.vmem_to_hbm [thread:$0]  (%p1278_p10), %s1471_s0, 256, %s1477_s3, %s1442_s22, %s1567_s12, %s1567_s12, %s1138_s17  }
 0x38d PF: > { %s613_s27 = sand.u32 1, %s1106_s24   ;;  %p1569_p3 = scmp.ne.s32.totalorder %s1552_s10, 0 }
 0x38e   : > { %p1570_p7 = scmp.ge.s32.totalorder %s1126_s29, 2  ;;  %s614_s19 = scalar_lea.sflag [#allocation4], %s613_s27 }
 0x390   : > { %p841_p4 = pnand %p1570_p7, %p1569_p3 }
 0x392   : > { %1097 = dma.done.wait (!%p841_p4), %s614_s19, 256  }
 0x393   : > { %1099 = vsyncadd (!%p841_p4), %s614_s19, 4294967040  ;;  %s1571_s14 = sadd.s32 4294967294, %s1126_s29  }
 0x394   : > { %s622_s16 = sand.u32 1, %s1571_s14  }
 0x395   : > { %s623_s20 = scalar_lea.sflag [#allocation9], %s622_s16 }
 0x396   : > { %1101 = dma.done.wait (!%p841_p4), %s623_s20, 512  }
 0x397   : > { %1103 = vsyncadd (!%p841_p4), %s623_s20, 4294966784  ;;  %s28_s29 = sadd.s32 1, %s1126_s29   ;;  %s1572_s24 = smov %s1110_s25 }
 0x398   : > { %p25_p10 = scmp.ge.s32.totalorder %s28_s29, 4   ;;  %s1573_s25 = smov %s1114_s26 }
 0x399   : > { %s1574_s26 = smov %s1287_s23  ;;  %s1575_s27 = smov %s1122_s28 }
 0x39a   : > { %s1576_s28 = smov %s1578_s15  ;;  %27 = sbr.rel (!%p25_p10) target bundleno = 12 (0xc), region = 121 }
 0x3a1   :  { %637 = vsyncpa [#allocation3], 1 }
 0x3a2   :  { %639 = vsyncpa [#allocation3 + $0x1], 1 }
 0x3a3   :  { %640 = vsyncpa [#allocation6], 1 }
 0x3a4   :  { %641 = vsyncpa [#allocation4], 1 }
 0x3a5   :  { %643 = vsyncpa [#allocation4 + $0x1], 1 }
 0x3a6   :  { %644 = vsyncpa [#allocation9], 1 }
 0x3a7   :  { %646 = vsyncpa [#allocation9 + $0x1], 1 }

</bundles_post_ra>
